<compile_context>
chip_gen: v6e
topology: v6e:2x2x1
jax: 0.10.0
libtpu: 0.0.40
codegen_flags: <defaults>
</compile_context>

<pallas_src>
import functools

import jax
import jax.numpy as jnp
from jax.experimental import pallas as pl
from jax.experimental.pallas import tpu as pltpu


def _center_loss_kernel(classes_ref, centers_ref, features_ref, out_ref, *,
                        scale, num_classes, num_features):
    """Per-tile center loss.

    classes_ref : (1, TILE_N) int32, VMEM   -- class id per sample (lane-dense)
    centers_ref : (C, F)      float32, SMEM -- scalar-read center table
    features_ref: (F, TILE_N) float32, VMEM -- features, N on the lane axis
    out_ref     : (1, TILE_N) float32, VMEM -- alpha * mean_f (center - feat)^2
    """
    cls = classes_ref[...]                                  # (1, TILE_N) int32
    acc = jnp.zeros(out_ref.shape, jnp.float32)             # (1, TILE_N)

    # Static Python loops: C and F are tiny compile-time constants (2, 2).
    for f in range(num_features):
        # Gather centers[classes, f] with a chain of VPU selects (no MXU).
        # Out-of-range class ids fall through to 0.0, matching the previous
        # one-hot implementation. TODO(synk): PyTorch's centers[classes] would
        # raise on invalid labels instead of producing 0.
        g = jnp.zeros(cls.shape, jnp.float32)
        for c in range(num_classes):
            g = jnp.where(cls == c, centers_ref[c, f], g)   # scalar from SMEM
        d = g - features_ref[pl.ds(f, 1), :]                # (1, TILE_N)
        acc = acc + d * d

    # scale == alpha / F folded into a single epilogue multiply.
    out_ref[...] = acc * scale


def center_loss(features, classes, centers, *, alpha=1.0, tile_n=512,
                interpret=False):
    """features: (N, F) f32, classes: (N,) int, centers: (C, F) f32 -> (N,) f32."""
    n, f = features.shape
    c = centers.shape[0]

    # Lane-dense transposed layout, padded so TILE_N (a multiple of 128)
    # divides the lane extent. Padded lanes use class 0 / feature 0 and are
    # sliced off after the call.
    n_pad = pl.cdiv(n, tile_n) * tile_n
    feats_t = jnp.pad(features.astype(jnp.float32).T, ((0, 0), (0, n_pad - n)))
    cls_row = jnp.pad(classes.astype(jnp.int32), (0, n_pad - n)).reshape(1, n_pad)

    kernel = functools.partial(
        _center_loss_kernel,
        scale=float(alpha) / float(f),
        num_classes=c,
        num_features=f,
    )

    out = pl.pallas_call(
        kernel,
        out_shape=jax.ShapeDtypeStruct((1, n_pad), jnp.float32),
        grid=(n_pad // tile_n,),
        in_specs=[
            pl.BlockSpec((1, tile_n), lambda i: (0, i)),          # classes row
            pl.BlockSpec(memory_space=pltpu.MemorySpace.SMEM),    # centers table
            pl.BlockSpec((f, tile_n), lambda i: (0, i)),          # features^T
        ],
        out_specs=pl.BlockSpec((1, tile_n), lambda i: (0, i)),
        compiler_params=pltpu.CompilerParams(
            dimension_semantics=("parallel",)),
        interpret=interpret,
    )(cls_row, centers.astype(jnp.float32), feats_t)

    return out[0, :n]


class IdNetCenterLossPallas:
    """JAX/Pallas equivalent of the PyTorch IdNetCenterLoss module."""

    def __init__(self, num_classes=2, num_features=2, alpha=1.0,
                 key=jax.random.PRNGKey(42)):
        # Deterministic stand-in for nn.Parameter(torch.randn(C, F)).
        self.centers = jax.random.normal(key, (num_classes, num_features),
                                         dtype=jnp.float32)
        self.alpha = alpha

    def __call__(self, batch):
        features = batch["features"]
        classes = batch["classes"]
        # OutputLoss just wraps the per-sample loss tensor.
        return center_loss(features, classes, self.centers, alpha=self.alpha)


if __name__ == "__main__":
    key = jax.random.PRNGKey(0)
    k_feat, k_cls, k_cent = jax.random.split(key, 3)

    N, C, F = 8, 2, 2
    features = jax.random.normal(k_feat, (N, F), dtype=jnp.float32)
    classes = jax.random.randint(k_cls, (N,), 0, C, dtype=jnp.int32)

    module = IdNetCenterLossPallas(num_classes=C, num_features=F, key=k_cent)

    loss = module({"features": features, "classes": classes})
    loss = jax.block_until_ready(loss)

    # Pure-JAX reference check.
    gathered = module.centers[classes]
    ref = jnp.mean((gathered - features) ** 2, axis=1)
    assert loss.shape == (N,)
    assert jnp.allclose(loss, ref, atol=1e-5, rtol=1e-5), (loss, ref)

    print("KERNEL_OK")
</pallas_src>

<mosaic_0001>
module attributes {stable_mosaic.version = 11 : i64} {
  func.func @_center_loss_kernel(%arg0: i32, %arg1: memref<1x512xi32, #tpu.memory_space<vmem>>, %arg2: memref<2x2xf32, #tpu.memory_space<smem>>, %arg3: memref<2x512xf32, #tpu.memory_space<vmem>>, %arg4: memref<1x512xf32, #tpu.memory_space<vmem>>) attributes {dimension_semantics = [#tpu.dimension_semantics<parallel>], iteration_bounds = array<i64: 1>, scalar_prefetch = 0 : i64, scratch_operands = 0 : i64, tpu.core_type = #tpu.core_type<tc>, window_params = [{transform_indices = @transform_0, window_bounds = array<i64: 1, 512>}, {transform_indices = @transform_1, window_bounds = array<i64: 2, 2>}, {transform_indices = @transform_2, window_bounds = array<i64: 2, 512>}, {transform_indices = @transform_3, window_bounds = array<i64: 1, 512>}]} {
    %c0 = arith.constant 0 : index
    %c0_0 = arith.constant 0 : index
    %0 = vector.load %arg1[%c0, %c0_0] : memref<1x512xi32, #tpu.memory_space<vmem>>, vector<1x512xi32>
    %cst = arith.constant 0.000000e+00 : f32
    %1 = vector.broadcast %cst : f32 to vector<1x512xf32>
    %cst_1 = arith.constant 0.000000e+00 : f32
    %2 = vector.broadcast %cst_1 : f32 to vector<1x512xf32>
    %c0_i32 = arith.constant 0 : i32
    %3 = vector.broadcast %c0_i32 : i32 to vector<1x512xi32>
    %4 = arith.cmpi eq, %0, %3 : vector<1x512xi32>
    %c0_2 = arith.constant 0 : index
    %c0_3 = arith.constant 0 : index
    %5 = memref.load %arg2[%c0_2, %c0_3] : memref<2x2xf32, #tpu.memory_space<smem>>
    %6 = vector.broadcast %5 : f32 to vector<1x512xf32>
    %7 = arith.select %4, %6, %2 : vector<1x512xi1>, vector<1x512xf32>
    %c1_i32 = arith.constant 1 : i32
    %8 = vector.broadcast %c1_i32 : i32 to vector<1x512xi32>
    %9 = arith.cmpi eq, %0, %8 : vector<1x512xi32>
    %c1 = arith.constant 1 : index
    %c0_4 = arith.constant 0 : index
    %10 = memref.load %arg2[%c1, %c0_4] : memref<2x2xf32, #tpu.memory_space<smem>>
    %11 = vector.broadcast %10 : f32 to vector<1x512xf32>
    %12 = arith.select %9, %11, %7 : vector<1x512xi1>, vector<1x512xf32>
    %c0_5 = arith.constant 0 : index
    %c0_6 = arith.constant 0 : index
    %13 = vector.load %arg3[%c0_5, %c0_6] : memref<2x512xf32, #tpu.memory_space<vmem>>, vector<1x512xf32>
    %14 = arith.subf %12, %13 : vector<1x512xf32>
    %15 = arith.mulf %14, %14 : vector<1x512xf32>
    %16 = arith.addf %1, %15 : vector<1x512xf32>
    %cst_7 = arith.constant 0.000000e+00 : f32
    %17 = vector.broadcast %cst_7 : f32 to vector<1x512xf32>
    %c0_i32_8 = arith.constant 0 : i32
    %18 = vector.broadcast %c0_i32_8 : i32 to vector<1x512xi32>
    %19 = arith.cmpi eq, %0, %18 : vector<1x512xi32>
    %c0_9 = arith.constant 0 : index
    %c1_10 = arith.constant 1 : index
    %20 = memref.load %arg2[%c0_9, %c1_10] : memref<2x2xf32, #tpu.memory_space<smem>>
    %21 = vector.broadcast %20 : f32 to vector<1x512xf32>
    %22 = arith.select %19, %21, %17 : vector<1x512xi1>, vector<1x512xf32>
    %c1_i32_11 = arith.constant 1 : i32
    %23 = vector.broadcast %c1_i32_11 : i32 to vector<1x512xi32>
    %24 = arith.cmpi eq, %0, %23 : vector<1x512xi32>
    %c1_12 = arith.constant 1 : index
    %c1_13 = arith.constant 1 : index
    %25 = memref.load %arg2[%c1_12, %c1_13] : memref<2x2xf32, #tpu.memory_space<smem>>
    %26 = vector.broadcast %25 : f32 to vector<1x512xf32>
    %27 = arith.select %24, %26, %22 : vector<1x512xi1>, vector<1x512xf32>
    %c1_14 = arith.constant 1 : index
    %c0_15 = arith.constant 0 : index
    %28 = vector.load %arg3[%c1_14, %c0_15] : memref<2x512xf32, #tpu.memory_space<vmem>>, vector<1x512xf32>
    %29 = arith.subf %27, %28 : vector<1x512xf32>
    %30 = arith.mulf %29, %29 : vector<1x512xf32>
    %31 = arith.addf %16, %30 : vector<1x512xf32>
    %cst_16 = arith.constant 5.000000e-01 : f32
    %32 = vector.broadcast %cst_16 : f32 to vector<1x512xf32>
    %33 = arith.mulf %31, %32 : vector<1x512xf32>
    %c0_17 = arith.constant 0 : index
    %c0_18 = arith.constant 0 : index
    %34 = vector.load %arg4[%c0_17, %c0_18] : memref<1x512xf32, #tpu.memory_space<vmem>>, vector<1x512xf32>
    tpu.vector_store %arg4[%c0_17, %c0_18], %33 {strides = array<i32>} : memref<1x512xf32, #tpu.memory_space<vmem>>, vector<1x512xf32>,
    return
  }
  func.func @transform_0(%arg0: i32) -> (i32, i32) {
    %c0_i32 = arith.constant 0 : i32
    %c0_i32_0 = arith.constant 0 : i32
    return %c0_i32, %arg0 : i32, i32
  }
  func.func @transform_1(%arg0: i32) -> (i32, i32) {
    %c0_i32 = arith.constant 0 : i32
    %c0_i32_0 = arith.constant 0 : i32
    %c0_i32_1 = arith.constant 0 : i32
    return %c0_i32, %c0_i32_0 : i32, i32
  }
  func.func @transform_2(%arg0: i32) -> (i32, i32) {
    %c0_i32 = arith.constant 0 : i32
    %c0_i32_0 = arith.constant 0 : i32
    return %c0_i32, %arg0 : i32, i32
  }
  func.func @transform_3(%arg0: i32) -> (i32, i32) {
    %c0_i32 = arith.constant 0 : i32
    %c0_i32_0 = arith.constant 0 : i32
    return %c0_i32, %arg0 : i32, i32
  }
}

</mosaic_0001>

<bundles_post_ra>
// kernel: tpu_custom_call.1
= control target key start
LH: loop header
LB: loop body
LE: loop exit
PB: predicated region body
PF: predicated region fallthrough
CT: control target
= control target key end

     0   :  { %8 = vsyncpa [#allocation3], 0  ;;  %s216_s0 = inlined_call_operand.hbm [shape: s32[1,512], index: 0, kind: input, shape index: {}]   ;;  %s217_s1 = inlined_call_operand.hbm [shape: f32[2,2], index: 1, kind: input, shape index: {}]   ;;  %s218_s2 = inlined_call_operand.hbm [shape: f32[2,512], index: 2, kind: input, shape index: {}]   ;;  %s219_s3 = inlined_call_operand.hbm [shape: f32[1,512], index: 3, kind: output, shape index: {}]  }
   0x1   :  { %9 = vsyncpa [#allocation5], 0 }
   0x2   :  { %10 = vsyncpa [#allocation8], 0 }
   0x3   :  { %11 = vsyncpa [#allocation4], 0  ;;  %s180_s12 = smov [#allocation2]   ;;  %s181_s14 = smov [#allocation7]  }
   0x4   :  { %s18_s13 = sshll.u32 %s180_s12, 4  ;;  %s36_s15 = sshll.u32 %s181_s14, 4  ;;  %s19_s13 = int_to_ptr.vmem [resolvable:$true] %s18_s13  ;;  %s37_s15 = int_to_ptr.vmem [resolvable:$true] %s36_s15 }
   0x5   :  { %s112_s16 = scalar_lea.vmem %s19_s13, 64  ;;  %p117_p1 = scmp.lt.s32.totalorder %s19_s13, %s19_s13 }
   0x6   :  { %p113_p0 = scmp.ne.s32.totalorder %s19_s13, %s112_s16  ;;  %p118_p2 = scmp.lt.s32.totalorder %s112_s16, %s112_s16 }
   0x8   :  { %p119_p3 = por %p118_p2, %p117_p1 }
   0xa   :  { %p120_p4 = pnand %p119_p3, %p113_p0 }
   0xc   :  { %123 = shalt.err (!%p120_p4)
}
   0xd   :  { %21 = dma.hbm_to_vmem [thread:$0]  %s216_s0, 64, %s19_s13, [#allocation3]  }
   0xe   :  { %s182_s19 = smov [#allocation6]   ;;  %s140_s22 = scalar_lea.vmem %s37_s15, 128 }
   0xf   :  { %29 = dma.hbm_to_smem %s217_s1, 32, %s182_s19, [#allocation5]  }
  0x10   :  { %p141_p5 = scmp.ne.s32.totalorder %s37_s15, %s140_s22  ;;  %p145_p6 = scmp.lt.s32.totalorder %s37_s15, %s37_s15 }
  0x11   :  { %p146_p7 = scmp.lt.s32.totalorder %s140_s22, %s140_s22 }
  0x13   :  { %p147_p8 = por %p146_p7, %p145_p6 }
  0x15   :  { %p148_p9 = pnand %p147_p8, %p141_p5 }
  0x17   :  { %151 = shalt.err (!%p148_p9)
}
  0x18   :  { %39 = dma.hbm_to_vmem [thread:$0]  %s218_s2, 128, %s37_s15, [#allocation8]  }
  0x19   :  { %172 = dma.done.wait [#allocation3], 64  }
  0x1a   :  { %173 = vsyncadd [#allocation3], 4294967232 }
  0x1b   :  { %174 = dma.done.wait [#allocation5], 32  }
  0x1c   :  { %175 = vsyncadd [#allocation5], 4294967264 }
  0x1d   :  { %176 = dma.done.wait [#allocation8], 128  }
  0x1e   :  { %177 = vsyncadd [#allocation8], 4294967168 }
  0x1f   :  { %49 = sfence }
  0x20   :  { %s52_s0 = sld [smem:[#allocation6]]  ;;  %v50_v0 = vld [vmem:[#allocation2] sm:$0xf]  ;;  %v59_v2 = vld [vmem:[#allocation7] ss:$2 sm:$0xf]  ;;  %v75_v14 = vlaneseq }
  0x21   :  { %s97_s1 = sld [smem:[#allocation6 + $0x80]]  ;;  %vm51_vm0 = vcmp.eq.s32.totalorder %v50_v0, 0  ;;  %vm55_vm1 = vcmp.eq.s32.totalorder %v50_v0, 1  ;;  %v70_v7 = vld [vmem:[#allocation7 + $0x1] ss:$2 sm:$0xf] }
  0x22   :  { %s98_s25 = sld [smem:[#allocation6 + $0x1]]  ;;  %s183_s2 = smov [#allocation9]   ;;  %vm77_vm2 = vcmp.lt.s32.totalorder %v75_v14, 512 }
  0x23   :  { %s99_s26 = sld [smem:[#allocation6 + $0x81]]  ;;  %s86_s27 = sshll.u32 %s183_s2, 4  ;;  %s87_s27 = int_to_ptr.vmem [resolvable:$true] %s86_s27 }
  0x24   :  { %s152_s28 = scalar_lea.vmem %s87_s27, 64  ;;  %p157_p11 = scmp.lt.s32.totalorder %s87_s27, %s87_s27 }
  0x25   :  { %p153_p10 = scmp.ne.s32.totalorder %s87_s27, %s152_s28  ;;  %p158_p12 = scmp.lt.s32.totalorder %s152_s28, %s152_s28 }
  0x26   :  { %v53_v1 = vstv %s52_s0 }
  0x27   :  { %v54_v3 = vsel %vm51_vm0, %v53_v1, 0.0  ;;  %v57_v4 = vstv %s97_s1  ;;  %p159_p13 = por %p158_p12, %p157_p11 }
  0x28   :  { %v58_v5 = vsel %vm55_vm1, %v57_v4, %v54_v3  ;;  %v64_v6 = vstv %s98_s25 }
  0x29   :  { %v60_v8 = vsub.f32 %v58_v5, %v59_v2  ;;  %v65_v9 = vsel %vm51_vm0, %v64_v6, 0.0  ;;  %v67_v10 = vstv %s99_s26  ;;  %p160_p0 = pnand %p159_p13, %p153_p10 }
  0x2a   :  { %v68_v11 = vsel %vm55_vm1, %v67_v10, %v65_v9 }
  0x2b   :  { %v61_v12 = vmul.f32 %v60_v8, %v60_v8  ;;  %v71_v13 = vsub.f32 %v68_v11, %v70_v7 }
  0x2d   :  { %v72_v15 = vmul.f32 %v71_v13, %v71_v13 }
  0x2f   :  { %v73_v16 = vadd.f32 %v72_v15, %v61_v12 }
  0x31   :  { %v74_v17 = vmul.f32 0.5, %v73_v16 }
  0x33   :  { %79 = vst.msk [vmem:[#allocation9] sm:$0xf] %vm77_vm2, %v74_v17 }
  0x34   :  { %163 = shalt.err (!%p160_p0)
}
  0x35   :  { %89 = dma.vmem_to_hbm [thread:$0]  %s87_s27, 64, %s219_s3, [#allocation4]  }
  0x36   :  { %178 = dma.done.wait [#allocation4], 64  }
  0x37   :  { %179 = vsyncadd [#allocation4], 4294967232 }
  0x38   :  { %93 = vsyncpa [#allocation3], 1 }
  0x39   :  { %94 = vsyncpa [#allocation8], 1 }
  0x3a   :  { %95 = vsyncpa [#allocation4], 1 }
  0x3b   :  { %96 = vsyncpa [#allocation5], 1 }

</bundles_post_ra>
